<compile_context>
chip_gen: v6e
topology: v6e:2x2x1
jax: 0.10.0
libtpu: 0.0.40
codegen_flags: <defaults>
</compile_context>

<pallas_src>
import jax
import jax.numpy as jnp
from jax import lax
from jax.experimental import pallas as pl
from jax.experimental.pallas import tpu as pltpu


def _round_up(x, m):
    return ((x + m - 1) // m) * m


# ---------------------------------------------------------------------------
# Kernel 1: per-node scores.  scores[v, :H] = source score, scores[v, H:] =
# target score of node v.  Tiled over N; the fused (F_in, 2H) operand stays
# resident via a constant index_map.
# ---------------------------------------------------------------------------
def _score_kernel(x_ref, a_ref, out_ref):
    out_ref[...] = jnp.dot(x_ref[...], a_ref[...],
                           preferred_element_type=jnp.float32)


# ---------------------------------------------------------------------------
# Kernel 2: N -> E lift + sigmoid.
#   src_ref / trg_ref : (E_pad,) int32, scalar-prefetched into SMEM
#   scores_ref        : (N_pad, 2H) f32, VMEM resident (constant index_map)
#   out_ref           : (E_tile, H) f32 output block (PyTorch layout)
# Each edge reads its two score rows with a dynamic-slice gather (O(H) work);
# the sigmoid is applied vectorized over the whole block afterwards.
# ---------------------------------------------------------------------------
def _lift_kernel(src_ref, trg_ref, scores_ref, out_ref):
    e_tile, h = out_ref.shape
    base = pl.program_id(0) * e_tile

    def body(i, carry):
        s = src_ref[base + i]                       # SMEM scalar reads
        t = trg_ref[base + i]
        row_s = scores_ref[pl.ds(s, 1), :]          # (1, 2H) gathered rows
        row_t = scores_ref[pl.ds(t, 1), :]
        out_ref[pl.ds(i, 1), :] = row_s[:, 0:h] + row_t[:, h:2 * h]
        return carry

    lax.fori_loop(0, e_tile, body, None, unroll=8)

    # Vectorized sigmoid epilogue.  This is a negligible fraction of the
    # kernel now that the one-hot matmul is gone, so we keep the exact divide
    # for bit-level agreement with the f32 reference (pl.reciprocal(...,
    # approx=True) is a valid drop-in if the VALU ever becomes the bottleneck).
    g = out_ref[...]
    out_ref[...] = 1.0 / (1.0 + jnp.exp(-g))


def graph_attention_forward(x, edge_index, w, a_src, a_trg, *,
                            node_tile=1024, edge_tile=2048,
                            compute_dtype=jnp.bfloat16):
    n, f_in = x.shape
    h, f_out = a_src.shape
    e = edge_index.shape[1]
    if compute_dtype is None:
        compute_dtype = x.dtype

    # --- glue: algebraically fold the projection W into the scoring vectors -
    #   score_src[v, hd] = sum_i x[v, i] * (sum_f W[i, hd, f] * a_src[hd, f])
    # so only an (F_in, 2H) operand reaches the kernels; W never enters VMEM.
    w3 = w.reshape(f_in, h, f_out).astype(jnp.float32)
    a_cols = jnp.concatenate(
        [jnp.einsum('ihf,hf->ih', w3, a_src.astype(jnp.float32)),
         jnp.einsum('ihf,hf->ih', w3, a_trg.astype(jnp.float32))],
        axis=1)                                              # (F_in, 2H)

    # --- kernel 1: per-node scores, tiled + pipelined over N ----------------
    n_tile = _round_up(min(int(node_tile), _round_up(n, 8)), 8)
    n_pad = _round_up(n, n_tile)
    x_p = jnp.pad(x, ((0, n_pad - n), (0, 0))).astype(compute_dtype)
    a_p = a_cols.astype(compute_dtype)

    scores = pl.pallas_call(
        _score_kernel,
        out_shape=jax.ShapeDtypeStruct((n_pad, 2 * h), jnp.float32),
        grid=(n_pad // n_tile,),
        in_specs=[
            pl.BlockSpec((n_tile, f_in), lambda i: (i, 0)),   # x tile
            pl.BlockSpec((f_in, 2 * h), lambda i: (0, 0)),    # fused A (resident)
        ],
        out_specs=pl.BlockSpec((n_tile, 2 * h), lambda i: (i, 0)),
        compiler_params=pltpu.CompilerParams(
            dimension_semantics=("parallel",)),
    )(x_p, a_p)

    # --- kernel 2: gather-based lift + sigmoid, tiled over E ----------------
    e_tile = _round_up(min(int(edge_tile), _round_up(e, 8)), 8)
    e_pad = _round_up(e, e_tile)
    src_ids = jnp.pad(edge_index[0].astype(jnp.int32), (0, e_pad - e))
    trg_ids = jnp.pad(edge_index[1].astype(jnp.int32), (0, e_pad - e))
    # TODO(synk): for very large graphs, tile the edge ids through SMEM blocks
    # (scalar prefetch keeps the full id arrays in SMEM) and shard the (N, 2H)
    # score table when it exceeds the scoped VMEM limit (32 MiB on v7x).

    out = pl.pallas_call(
        _lift_kernel,
        out_shape=jax.ShapeDtypeStruct((e_pad, h), jnp.float32),
        grid_spec=pltpu.PrefetchScalarGridSpec(
            num_scalar_prefetch=2,
            grid=(e_pad // e_tile,),
            in_specs=[pl.BlockSpec((n_pad, 2 * h), lambda i, s, t: (0, 0))],
            out_specs=pl.BlockSpec((e_tile, h), lambda i, s, t: (i, 0)),
        ),
        compiler_params=pltpu.CompilerParams(
            dimension_semantics=("parallel",)),
    )(src_ids, trg_ids, scores)

    # Output is already in the PyTorch (E, H) layout; drop padded edge rows.
    return out[:e]


def _reference(x, edge_index, w, a_src, a_trg):
    """Pure-JAX mirror of the PyTorch forward pass (correctness check)."""
    h, f_out = a_src.shape
    proj = (x.astype(jnp.float32) @ w.astype(jnp.float32)).reshape(
        x.shape[0], h, f_out)
    ss = (proj * a_src[None]).sum(-1)            # (N, H)
    st = (proj * a_trg[None]).sum(-1)            # (N, H)
    return jax.nn.sigmoid(ss[edge_index[0]] + st[edge_index[1]])


if __name__ == "__main__":
    def make_problem(key, n, f_in, h, f_out, e):
        kx, ke, kw, ks, kt = jax.random.split(key, 5)
        x = jax.random.normal(kx, (n, f_in), dtype=jnp.float32)
        edge_index = jax.random.randint(ke, (2, e), 0, n, dtype=jnp.int32)
        # Xavier-uniform-style init (matches the module's __init__ shapes).
        bound_w = (6.0 / (f_in + h * f_out)) ** 0.5
        w = jax.random.uniform(kw, (f_in, h * f_out), jnp.float32,
                               -bound_w, bound_w)
        bound_a = (6.0 / (h * f_out + f_out)) ** 0.5
        a_src = jax.random.uniform(ks, (h, f_out), jnp.float32, -bound_a, bound_a)
        a_trg = jax.random.uniform(kt, (h, f_out), jnp.float32, -bound_a, bound_a)
        return x, edge_index, w, a_src, a_trg

    key = jax.random.PRNGKey(0)
    k1, k2 = jax.random.split(key)

    # --- small problem (toy shapes from the module) --------------------------
    x, edge_index, w, a_src, a_trg = make_problem(k1, 8, 16, 4, 8, 12)
    ref = _reference(x, edge_index, w, a_src, a_trg)

    out_f32 = jax.block_until_ready(
        graph_attention_forward(x, edge_index, w, a_src, a_trg,
                                compute_dtype=jnp.float32))
    assert out_f32.shape == (12, 4), out_f32.shape
    assert jnp.allclose(out_f32, ref, atol=1e-5, rtol=1e-5), (out_f32, ref)

    out_bf16 = jax.block_until_ready(
        graph_attention_forward(x, edge_index, w, a_src, a_trg))  # bf16 default
    assert jnp.allclose(out_bf16, ref, atol=1e-2, rtol=1e-2), (out_bf16, ref)

    # --- slightly larger problem: exercises multiple node & edge tiles -------
    x, edge_index, w, a_src, a_trg = make_problem(k2, 200, 64, 4, 8, 500)
    ref = _reference(x, edge_index, w, a_src, a_trg)

    out2 = jax.block_until_ready(
        graph_attention_forward(x, edge_index, w, a_src, a_trg,
                                node_tile=64, edge_tile=128,
                                compute_dtype=jnp.float32))
    assert out2.shape == (500, 4), out2.shape
    assert jnp.allclose(out2, ref, atol=1e-5, rtol=1e-5)

    out2_bf16 = jax.block_until_ready(
        graph_attention_forward(x, edge_index, w, a_src, a_trg,
                                node_tile=64, edge_tile=128))
    assert jnp.allclose(out2_bf16, ref, atol=1e-2, rtol=1e-2)

    print("KERNEL_OK")
</pallas_src>

<mosaic_0001>
module attributes {stable_mosaic.version = 11 : i64} {
  func.func @_score_kernel(%arg0: i32, %arg1: memref<8x16xf32, #tpu.memory_space<vmem>>, %arg2: memref<16x8xf32, #tpu.memory_space<vmem>>, %arg3: memref<8x8xf32, #tpu.memory_space<vmem>>) attributes {dimension_semantics = [#tpu.dimension_semantics<parallel>], iteration_bounds = array<i64: 1>, scalar_prefetch = 0 : i64, scratch_operands = 0 : i64, tpu.core_type = #tpu.core_type<tc>, window_params = [{transform_indices = @transform_0, window_bounds = array<i64: 8, 16>}, {pipeline_mode = #tpu.pipeline_mode<synchronous>, transform_indices = @transform_1, window_bounds = array<i64: 16, 8>}, {transform_indices = @transform_2, window_bounds = array<i64: 8, 8>}]} {
    %c0 = arith.constant 0 : index
    %c0_0 = arith.constant 0 : index
    %0 = vector.load %arg1[%c0, %c0_0] : memref<8x16xf32, #tpu.memory_space<vmem>>, vector<8x16xf32>
    %c0_1 = arith.constant 0 : index
    %c0_2 = arith.constant 0 : index
    %1 = vector.load %arg2[%c0_1, %c0_2] : memref<16x8xf32, #tpu.memory_space<vmem>>, vector<16x8xf32>
    %cst = arith.constant dense<0.000000e+00> : vector<8x8xf32>
    %2 = tpu.matmul %0, %1, %cst {dimension_numbers = #tpu.dot_dimension_numbers<[1], [0], [0], [1], [0, 0, 1, 1], [], []>} : vector<8x16xf32>, vector<16x8xf32>, vector<8x8xf32> -> vector<8x8xf32>
    %c0_3 = arith.constant 0 : index
    %c0_4 = arith.constant 0 : index
    %3 = vector.load %arg3[%c0_3, %c0_4] : memref<8x8xf32, #tpu.memory_space<vmem>>, vector<8x8xf32>
    tpu.vector_store %arg3[%c0_3, %c0_4], %2 {strides = array<i32>} : memref<8x8xf32, #tpu.memory_space<vmem>>, vector<8x8xf32>,
    return
  }
  func.func @transform_0(%arg0: i32) -> (i32, i32) {
    %c0_i32 = arith.constant 0 : i32
    %c0_i32_0 = arith.constant 0 : i32
    return %arg0, %c0_i32 : i32, i32
  }
  func.func @transform_1(%arg0: i32) -> (i32, i32) {
    %c0_i32 = arith.constant 0 : i32
    %c0_i32_0 = arith.constant 0 : i32
    %c0_i32_1 = arith.constant 0 : i32
    return %c0_i32, %c0_i32_0 : i32, i32
  }
  func.func @transform_2(%arg0: i32) -> (i32, i32) {
    %c0_i32 = arith.constant 0 : i32
    %c0_i32_0 = arith.constant 0 : i32
    return %arg0, %c0_i32 : i32, i32
  }
}

</mosaic_0001>

<bundles_post_ra>
// kernel: tpu_custom_call.1
= control target key start
LH: loop header
LB: loop body
LE: loop exit
PB: predicated region body
PF: predicated region fallthrough
CT: control target
= control target key end

     0   :  { %v141_v1 = vmov 0.0   ;;  %vm142_vm0 = vmmov 0   ;;  %s171_s0 = inlined_call_operand.vmem [shape: f32[8,16], index: 0, kind: input, shape index: {}]   ;;  %s172_s1 = inlined_call_operand.vmem [shape: f32[16,8], index: 1, kind: input, shape index: {}]   ;;  %s173_s2 = inlined_call_operand.hbm [shape: f32[8,8], index: 2, kind: output, shape index: {}]  }
   0x1   :  { %v14_v0 = vld [vmem:[%s172_s1 + $0x8] sm:$0xff]  ;;  %109 = vmatprep.subr.mxu0 %v141_v1  ;;  %v13_v2 = vld [vmem:[%s172_s1] sm:$0xff]  ;;  %113 = vmatprep.mubr.msk.f32.mxu0 %vm142_vm0, %v141_v1 }
   0x2   :  { %7 = vsyncpa [#allocation3], 0  ;;  %110 = vmatpush3.msra.mxu0 %v14_v0  ;;  %v12_v3 = vld [vmem:[%s171_s0] sm:$0xff]  ;;  %vm15_vm1 = vcmask 130048   ;;  %s143_s15 = smov [#allocation2]   ;;  %vm89_vm2 = vcmask 64512  }
   0x3   :  { %111 = vmatprep.subr.mxu0 %v141_v1  ;;  %s97_s16 = sshll.u32 %s143_s15, 4  ;;  %s98_s16 = int_to_ptr.vmem [resolvable:$true] %s97_s16 }
   0x4   :  { %112 = vmatpush3.msra.mxu0 %v13_v2  ;;  %s119_s1 = scalar_lea.vmem %s98_s16, 128  ;;  %p124_p1 = scmp.lt.s32.totalorder %s98_s16, %s98_s16 }
   0x5   :  { %114 = vmatmul.mubr.msk.f32.vlgmr.msra.gmra.mxu0 %vm15_vm1, %v12_v3  ;;  %p120_p0 = scmp.ne.s32.totalorder %s98_s16, %s119_s1  ;;  %p125_p2 = scmp.lt.s32.totalorder %s119_s1, %s119_s1 }
   0x7   :  { %p126_p3 = por %p125_p2, %p124_p1 }
   0x9   :  { %p127_p4 = pnand %p126_p3, %p120_p0 }
  0xc5   :  { %v85_v4 = vpop.f32.mrf.mxu0 }
  0xc6   :  { %90 = vst.msk [vmem:[#allocation2] sm:$0xff] %vm89_vm2, %v85_v4 }
  0xc7   :  { %v115_v5 = vpop.f32.mrf.mxu0 }
  0xc8   :  { %130 = shalt.err (!%p127_p4)
}
  0xc9   :  { %100 = dma.vmem_to_hbm [thread:$0]  %s98_s16, 128, %s173_s2, [#allocation3]  }
  0xca   :  { %139 = dma.done.wait [#allocation3], 128  }
  0xcb   :  { %140 = vsyncadd [#allocation3], 4294967168 }
  0xcc   :  { %104 = vsyncpa [#allocation3], 1 }

</bundles_post_ra>
